<compile_context>
chip_gen: v6e
topology: v6e:2x2x1
jax: 0.10.0
libtpu: 0.0.40
codegen_flags: <defaults>
</compile_context>

<pallas_src>
import jax
import jax.numpy as jnp
from jax.experimental import pallas as pl
from jax.experimental.pallas import tpu as pltpu


def _jitter_kernel(mask_ref, x_ref, o_ref):
    """One block = (bt, L, TF): `bt` fused batch elements, full length, one F tile.

    mask_ref: VMEM, shape (1, L, 2) int32 — [:, :, 0] = left mask, [:, :, 1] = right
              mask; its BlockSpec index is constant, so it is resident (no re-DMA).
    x_ref/o_ref: VMEM blocks of shape (bt, L, TF).
    """
    lm = mask_ref[:, :, 0:1] != 0          # (1, L, 1) — broadcasts over batch & lanes
    rm = mask_ref[:, :, 1:2] != 0          # (1, L, 1)

    x = x_ref[...]                         # (bt, L, TF), native dtype
    # Shift along the length (sublane) axis.  The boundary rows simply repeat the
    # original value; they are never selected because lm[0] and rm[L-1] are forced 0.
    x_left = jnp.concatenate([x[:, :1, :], x[:, :-1, :]], axis=1)   # x_left[t]  = x[t-1]
    x_right = jnp.concatenate([x[:, 1:, :], x[:, -1:, :]], axis=1)  # x_right[t] = x[t+1]

    out = jnp.where(lm, x_left, x)
    out = jnp.where(rm, x_right, out)      # right wins on overlap, as in torch
    o_ref[...] = out


def jitter_pallas(x, key, p=0.12, training=True):
    """Apply VQ-VAE jitter regularisation. x: (B, L, F)."""
    if (not training) or p == 0.0:
        return x

    B, L, F = x.shape
    if L < 2:
        # Both boundary masks are forced off, so the op is the identity.
        return x
    itemsize = x.dtype.itemsize

    # ---- tiling ---------------------------------------------------------------
    # ~4 MiB blocks: double-buffered in+out (~4x block = 16 MiB) plus intermediates
    # stays well under the explicit 48 MiB scoped-VMEM limit on v5e/v6e/v7x, while
    # keeping the ~0.35 us per-grid-step overhead to a few percent of DMA time.
    max_block_bytes = 4 << 20

    # Feature (lane) tile: multiple of 128 when possible for lane-dense DMA/stores.
    if F % 128 == 0:
        tf = 128
        while F % (tf * 2) == 0 and (tf * 2) * L * itemsize <= max_block_bytes:
            tf *= 2
    else:
        # TODO(synk): for F not a multiple of 128 stores stay lane-sparse; a
        # lane-dense layout would need a wrapper-side reshape folding timesteps
        # into the lane axis (extra HBM passes), which is skipped.
        tf = F
    n_f = F // tf

    # Batch fusion: amortise the per-grid-step overhead on small shapes.
    per_batch_bytes = L * tf * itemsize
    bt = max(1, min(B, max_block_bytes // max(per_batch_bytes, 1), 32))
    while B % bt != 0:
        bt -= 1
    n_b = B // bt

    # Guarantee >= 2 grid steps so dual-TensorCore chips (v7x) get both cores busy.
    if n_b * n_f == 1:
        if B >= 2:
            bt = max(1, B // 2)
            while B % bt != 0:
                bt -= 1
            n_b = B // bt
        elif tf % 256 == 0:
            tf //= 2
            n_f = F // tf
    # TODO(synk): extremely long L (a single (1, L, tf) block exceeding VMEM even at
    # tf=128) would need L-axis tiling with a 1-row halo; not implemented.

    # ---- per-timestep Bernoulli masks (computed once, outside the kernel) ------
    k_l, k_r = jax.random.split(key)
    lm = jax.random.bernoulli(k_l, p, (L,)).at[0].set(False)       # no left-copy at t=0
    rm = jax.random.bernoulli(k_r, p, (L,)).at[L - 1].set(False)   # no right-copy at t=L-1
    masks = jnp.stack([lm, rm], axis=-1).astype(jnp.int32)[None]   # (1, L, 2)

    out = pl.pallas_call(
        _jitter_kernel,
        out_shape=jax.ShapeDtypeStruct((B, L, F), x.dtype),
        grid=(n_b, n_f),
        in_specs=[
            # Constant block index -> mask stays resident across the whole grid.
            pl.BlockSpec((1, L, 2), lambda i, j: (0, 0, 0)),
            pl.BlockSpec((bt, L, tf), lambda i, j: (i, 0, j)),
        ],
        out_specs=pl.BlockSpec((bt, L, tf), lambda i, j: (i, 0, j)),
        compiler_params=pltpu.CompilerParams(
            dimension_semantics=("parallel", "parallel"),
            vmem_limit_bytes=48 * 1024 * 1024,
        ),
        cost_estimate=pl.CostEstimate(
            flops=0,
            transcendentals=0,
            bytes_accessed=2 * B * L * F * itemsize,
        ),
    )(masks, x)
    return out


def _check_jitter_semantics(x, out):
    """Structural check of the forward semantics.

    Every timestep's output row must be a whole-row copy of itself or of an
    adjacent timestep, with the SAME choice for every batch element and feature
    (the mask is per-timestep only), and the boundary timesteps must respect the
    forced-off masks (no left-copy at t=0, no right-copy at t=L-1).
    """
    keep = x
    left = jnp.pad(x, ((0, 0), (1, 0), (0, 0)))[:, :-1]   # left[t]  = x[t-1]
    right = jnp.pad(x, ((0, 0), (0, 1), (0, 0)))[:, 1:]   # right[t] = x[t+1]
    eq_keep = jnp.all(out == keep, axis=(0, 2))            # (L,)
    eq_left = jnp.all(out == left, axis=(0, 2))
    eq_right = jnp.all(out == right, axis=(0, 2))
    assert bool(jnp.all(eq_keep | eq_left | eq_right)), "row is not keep/left/right"
    assert bool(eq_keep[0] | eq_right[0]), "left-copy leaked into t=0"
    assert bool(eq_keep[-1] | eq_left[-1]), "right-copy leaked into t=L-1"


def _reference_jitter(x, key, p):
    """Pure-JAX reference replicating the torch forward with the same masks."""
    L = x.shape[1]
    k_l, k_r = jax.random.split(key)
    lm = jax.random.bernoulli(k_l, p, (L,)).at[0].set(False)[None, :, None]
    rm = jax.random.bernoulli(k_r, p, (L,)).at[L - 1].set(False)[None, :, None]
    x_left = jnp.pad(x, ((0, 0), (1, 0), (0, 0)))[:, :-1]
    x_right = jnp.pad(x, ((0, 0), (0, 1), (0, 0)))[:, 1:]
    out = jnp.where(lm, x_left, x)
    return jnp.where(rm, x_right, out)


if __name__ == "__main__":
    root = jax.random.PRNGKey(0)
    k_x1, k_m1, k_x2, k_m2 = jax.random.split(root, 4)

    # --- small f32 test: F < 128 (lane-sparse fallback path) ----------------------
    B, L, F = 2, 16, 32
    x = jax.random.normal(k_x1, (B, L, F), dtype=jnp.float32)
    out = jax.block_until_ready(jitter_pallas(x, k_m1, p=0.12, training=True))
    assert out.shape == x.shape and out.dtype == x.dtype
    _check_jitter_semantics(x, out)
    ref = _reference_jitter(x, k_m1, 0.12)
    assert bool(jnp.array_equal(out, ref)), "mismatch vs pure-JAX reference"

    # --- bf16 test: F a multiple of 128 (lane-dense tiled path) -------------------
    B2, L2, F2 = 2, 64, 256
    x2 = jax.random.normal(k_x2, (B2, L2, F2), dtype=jnp.float32).astype(jnp.bfloat16)
    out2 = jax.block_until_ready(jitter_pallas(x2, k_m2, p=0.3, training=True))
    assert out2.shape == x2.shape and out2.dtype == x2.dtype
    _check_jitter_semantics(x2, out2)
    ref2 = _reference_jitter(x2, k_m2, 0.3)
    assert bool(jnp.array_equal(out2, ref2)), "bf16 mismatch vs pure-JAX reference"

    # --- eval / p == 0 paths are identity -----------------------------------------
    assert jnp.array_equal(jitter_pallas(x, k_m1, p=0.12, training=False), x)
    assert jnp.array_equal(jitter_pallas(x, k_m1, p=0.0, training=True), x)

    print("KERNEL_OK")
</pallas_src>

<mosaic_0001>
module attributes {stable_mosaic.version = 11 : i64} {
  func.func @_jitter_kernel(%arg0: i32, %arg1: i32, %arg2: memref<1x16x2xi32, #tpu.memory_space<vmem>>, %arg3: memref<1x16x32xf32, #tpu.memory_space<vmem>>, %arg4: memref<1x16x32xf32, #tpu.memory_space<vmem>>) attributes {dimension_semantics = [#tpu.dimension_semantics<parallel>, #tpu.dimension_semantics<parallel>], iteration_bounds = array<i64: 2, 1>, scalar_prefetch = 0 : i64, scratch_operands = 0 : i64, tpu.core_type = #tpu.core_type<tc>, window_params = [{pipeline_mode = #tpu.pipeline_mode<synchronous>, transform_indices = @transform_0, window_bounds = array<i64: 1, 16, 2>}, {transform_indices = @transform_1, window_bounds = array<i64: 1, 16, 32>}, {transform_indices = @transform_2, window_bounds = array<i64: 1, 16, 32>}]} {
    %c0 = arith.constant 0 : index
    %c0_0 = arith.constant 0 : index
    %c0_1 = arith.constant 0 : index
    %0 = vector.load %arg2[%c0, %c0_0, %c0_1] : memref<1x16x2xi32, #tpu.memory_space<vmem>>, vector<1x16x1xi32>
    %c0_i32 = arith.constant 0 : i32
    %1 = vector.broadcast %c0_i32 : i32 to vector<1x16x1xi32>
    %2 = arith.cmpi ne, %0, %1 : vector<1x16x1xi32>
    %c0_2 = arith.constant 0 : index
    %c0_3 = arith.constant 0 : index
    %c1 = arith.constant 1 : index
    %3 = vector.load %arg2[%c0_2, %c0_3, %c1] : memref<1x16x2xi32, #tpu.memory_space<vmem>>, vector<1x16x1xi32>
    %c0_i32_4 = arith.constant 0 : i32
    %4 = vector.broadcast %c0_i32_4 : i32 to vector<1x16x1xi32>
    %5 = arith.cmpi ne, %3, %4 : vector<1x16x1xi32>
    %c0_5 = arith.constant 0 : index
    %c0_6 = arith.constant 0 : index
    %c0_7 = arith.constant 0 : index
    %6 = vector.load %arg3[%c0_5, %c0_6, %c0_7] : memref<1x16x32xf32, #tpu.memory_space<vmem>>, vector<1x16x32xf32>
    %7 = vector.extract_strided_slice %6 {offsets = [0, 0, 0], sizes = [1, 1, 32], strides = [1, 1, 1]} : vector<1x16x32xf32> to vector<1x1x32xf32>
    %8 = vector.extract_strided_slice %6 {offsets = [0, 0, 0], sizes = [1, 15, 32], strides = [1, 1, 1]} : vector<1x16x32xf32> to vector<1x15x32xf32>
    %9 = tpu.concatenate %7, %8 in 1 : vector<1x1x32xf32>, vector<1x15x32xf32> -> vector<1x16x32xf32>
    %10 = vector.extract_strided_slice %6 {offsets = [0, 1, 0], sizes = [1, 15, 32], strides = [1, 1, 1]} : vector<1x16x32xf32> to vector<1x15x32xf32>
    %11 = vector.extract_strided_slice %6 {offsets = [0, 15, 0], sizes = [1, 1, 32], strides = [1, 1, 1]} : vector<1x16x32xf32> to vector<1x1x32xf32>
    %12 = tpu.concatenate %10, %11 in 1 : vector<1x15x32xf32>, vector<1x1x32xf32> -> vector<1x16x32xf32>
    %13 = vector.shape_cast %2 : vector<1x16x1xi1> to vector<1x16x1xi1>
    %14 = vector.broadcast %13 : vector<1x16x1xi1> to vector<1x16x32xi1>
    %15 = arith.select %14, %9, %6 : vector<1x16x32xi1>, vector<1x16x32xf32>
    %16 = vector.shape_cast %5 : vector<1x16x1xi1> to vector<1x16x1xi1>
    %17 = vector.broadcast %16 : vector<1x16x1xi1> to vector<1x16x32xi1>
    %18 = arith.select %17, %12, %15 : vector<1x16x32xi1>, vector<1x16x32xf32>
    %c0_8 = arith.constant 0 : index
    %c0_9 = arith.constant 0 : index
    %c0_10 = arith.constant 0 : index
    %19 = vector.load %arg4[%c0_8, %c0_9, %c0_10] : memref<1x16x32xf32, #tpu.memory_space<vmem>>, vector<1x16x32xf32>
    tpu.vector_store %arg4[%c0_8, %c0_9, %c0_10], %18 {strides = array<i32>} : memref<1x16x32xf32, #tpu.memory_space<vmem>>, vector<1x16x32xf32>,
    return
  }
  func.func @transform_0(%arg0: i32, %arg1: i32) -> (i32, i32, i32) {
    %c0_i32 = arith.constant 0 : i32
    %c0_i32_0 = arith.constant 0 : i32
    %c0_i32_1 = arith.constant 0 : i32
    %c0_i32_2 = arith.constant 0 : i32
    return %c0_i32, %c0_i32_0, %c0_i32_1 : i32, i32, i32
  }
  func.func @transform_1(%arg0: i32, %arg1: i32) -> (i32, i32, i32) {
    %c0_i32 = arith.constant 0 : i32
    %c0_i32_0 = arith.constant 0 : i32
    return %arg0, %c0_i32, %arg1 : i32, i32, i32
  }
  func.func @transform_2(%arg0: i32, %arg1: i32) -> (i32, i32, i32) {
    %c0_i32 = arith.constant 0 : i32
    %c0_i32_0 = arith.constant 0 : i32
    return %arg0, %c0_i32, %arg1 : i32, i32, i32
  }
}

</mosaic_0001>

<bundles_post_ra>
// kernel: tpu_custom_call.1
= control target key start
LH: loop header
LB: loop body
LE: loop exit
PB: predicated region body
PF: predicated region fallthrough
CT: control target
= control target key end

     0   :  { %7 = vsyncpa [#allocation3], 0  ;;  %s709_s0 = inlined_call_operand.vmem [shape: s32[1,16,2], index: 0, kind: input, shape index: {}]   ;;  %s710_s1 = inlined_call_operand.hbm [shape: f32[2,16,32], index: 1, kind: input, shape index: {}]   ;;  %s711_s2 = inlined_call_operand.hbm [shape: f32[2,16,32], index: 2, kind: output, shape index: {}]  }
   0x1   :  { %9 = vsyncpa [#allocation3 + $0x1], 0 }
   0x2   :  { %10 = vsyncpa [#allocation4], 0 }
   0x3   :  { %12 = vsyncpa [#allocation4 + $0x1], 0  ;;  %s547_s9 = smov 0   ;;  %s549_s10 = smov 0  }
   0x4   :  { %s551_s11 = smov 0   ;;  %s553_s12 = smov 0  }
   0x5   :  { %s555_s13 = smov 0   ;;  %s557_s14 = smov 0  }
   0x6 LB: > { %s326_s15 = sadd.s32 4294967295, %s522_s14   ;;  %s327_s16 = sadd.s32 4294967294, %s522_s14   ;;  %s522_s14 = sphi %s557_s14, %s18_s14   ;;  %s518_s13 = sphi %s555_s13, %s722_s13   ;;  %s514_s12 = sphi %s553_s12, %s721_s12   ;;  %s510_s11 = sphi %s551_s11, %s720_s11   ;;  %s506_s10 = sphi %s549_s10, %s719_s10   ;;  %s502_s9 = sphi %s547_s9, %s718_s9  }
   0x7   : > { %s30_s17 = sadd.s32 1, %s518_s13  ;;  %s60_s18 = sadd.s32 1, %s510_s11 }
   0x8   : > { %p32_p0 = scmp.ge.s32.totalorder %s30_s17, 2  ;;  %p67_p1 = scmp.ne.s32.totalorder %s510_s11, %s506_s10 }
   0x9   : > { %p68_p2 = scmp.eq.s32.totalorder %s522_s14, 0  ;;  %p73_p3 = scmp.ne.s32.totalorder %s506_s10, %s502_s9 }
   0xa   : > { %s724_s17 = smov (%p32_p0, %s30_s17), 0  ;;  %p74_p5 = scmp.eq.s32.totalorder %s326_s15, 0 }
   0xb   : > { %p588_p4 = por %p68_p2, %p67_p1  ;;  %s55_s20 = ssub.s32 %s518_s13, %s724_s17 }
   0xc   : > { %p99_p6 = scmp.eq.s32.totalorder %s326_s15, 1  ;;  %p58_p7 = scmp.eq.s32.totalorder %s55_s20, 0 }
   0xd   : > { %p594_p8 = por %p74_p5, %p73_p3  ;;  %p105_p10 = scmp.eq.s32.totalorder %s327_s16, 1 }
   0xe   : > { %p598_p9 = por %p99_p6, %p67_p1  ;;  %p355_p13 = scmp.lt.s32.totalorder %s522_s14, 2 }
   0xf   : > { %s603_s23 = scalar_select %p58_p7, %s510_s11, %s60_s18  }
  0x10   : > { %p605_p11 = por %p105_p10, %p73_p3  ;;  %s128_s25 = sand.u32 1, %s510_s11  }
  0x11   : > { %s330_s26 = sshll.u32 %s128_s25, 4  ;;  %s341_s27 = sshll.u32 %s518_s13, 8 }
  0x12   : > { %s139_s30 = scalar_lea.hbm %s710_s1, %s341_s27  ;;  %s132_s3 = scalar_lea.vmem [#allocation2], %s330_s26 }
  0x13   : > { %s140_s4 = sshll.u32 %s132_s3, 4  ;;  %p618_p0 = pnand %p355_p13, %p588_p4  ;;  %s141_s4 = int_to_ptr.vmem [resolvable:$true] %s140_s4 }
  0x14   : > { %p333_p1 = scmp.ge.s32.totalorder %s522_s14, 1  ;;  %s129_s6 = scalar_lea.sflag [#allocation3], %s128_s25 }
  0x15   : > { %p416_p2 = pneg %p618_p0  ;;  %s427_s7 = scalar_lea.vmem %s141_s4, 256 }
  0x16   : > { %p428_p3 = scmp.ne.s32.totalorder %s141_s4, %s427_s7  ;;  %s524_s8 = smov [#allocation2]  }
  0x17   : > { %s432_s15 = sshll.u32 %s524_s8, 4  ;;  %s433_s15 = int_to_ptr.vmem [resolvable:$false] %s432_s15 }
  0x18   : > { %p430_p5 = pnand %p428_p3, %p416_p2  ;;  %s434_s16 = scalar_lea.vmem %s433_s15, 512 }
  0x19   : > { %p435_p7 = scmp.lt.s32.totalorder %s141_s4, %s433_s15  ;;  %p436_p10 = scmp.lt.s32.totalorder %s434_s16, %s427_s7 }
  0x1a   : > { %p431_p6 = pneg %p430_p5 }
  0x1b   : > { %p437_p12 = por %p436_p10, %p435_p7 }
  0x1d   : > { %p438_p4 = pnand %p437_p12, %p431_p6 }
  0x1f   : > { %441 = shalt.err (!%p438_p4)
}
  0x20   : > { %s525_s18 = smov 128   ;;  %s526_s19 = smov 8  }
  0x21   : > { %350 = dma.hbm_to_vmem [thread:$0]  (!%p618_p0), %s139_s30, 256, %s141_s4, %s129_s6, %s525_s18, %s525_s18, %s526_s19  }
  0x22   : > { %p148_p13 = scmp.lt.s32.totalorder %s522_s14, 3 }
  0x24   : > { %p149_p2 = pnand %p333_p1, %p148_p13 }
  0x25   : > { %s631_s20 = sand.u32 (!%p149_p2), 1, %s506_s10  }
  0x26   : > { %152 = sbr.rel (%p149_p2) target bundleno = 192 (0xc0), region = 28  ;;  %s334_s25 = sshll.u32 (!%p149_p2), %s631_s20, 4 }
  0x27   : > { %s155_s26 = scalar_lea.sflag (!%p149_p2), [#allocation3], %s631_s20  ;;  %s158_s27 = scalar_lea.vmem (!%p149_p2), [#allocation2], %s334_s25 }
  0x2b   : > { %493 = dma.done.wait (%p594_p8), %s155_s26, 256  }
  0x2c   : > { %495 = vsyncadd (%p594_p8), %s155_s26, 4294967040  ;;  %v527_v0 = vmov 1   ;;  %v528_v1 = vmov 0   ;;  %v179_v2 = vld [vmem:[%s709_s0] sm:$0xff]  ;;  %v180_v3 = vld [vmem:[%s709_s0 + $0x8] sm:$0xff]  ;;  %vm187_vm2 = vcmask 1040384  }
  0x2d   : > { %412 = vset.pattern.permute.xlu1 %v527_v0  ;;  %411 = vset.pattern.permute.xlu0 %v528_v1  ;;  %vm181_vm0 = vcmp.ne.s32.totalorder %v179_v2, 0  ;;  %vm182_vm1 = vcmp.ne.s32.totalorder %v180_v3, 0  ;;  %v183_v6 = vld [vmem:[%s158_s27] sm:$0xff]  ;;  %v184_v7 = vld [vmem:[%s158_s27 + $0x8] sm:$0xff]  ;;  %vm194_vm3 = vcmask 1046528   ;;  %vm223_vm5 = vcmask 261120  }
  0x2e   : > { %v201_v4 = vsel %vm181_vm0, 1, %v528_v1  ;;  %v202_v5 = vsel %vm182_vm1, 1, %v528_v1  ;;  %v188_v8 = vrot.slane %v183_v6, 7  ;;  %v195_v9 = vrot.slane %v183_v6, 1  ;;  %s178_s21 = scalar_lea.vmem [#allocation5], %s334_s25  ;;  %s342_s5 = sshll.u32 %s514_s12, 8 }
  0x2f   : > { %214 = vperm.xlu1 %412, %v201_v4   ;;  %204 = vperm.xlu0 %411, %v201_v4   ;;  %v196_v10 = vrot.slane %v184_v7, 1  ;;  %v189_v12 = vrot.slane %v184_v7, 7  ;;  %s241_s4 = sshll.u32 %s178_s21, 4  ;;  %s658_s8 = scalar_lea.hbm %s711_s2, %s342_s5  ;;  %s660_s4 = int_to_ptr.vmem [resolvable:$true] %s241_s4 }
  0x30   : > { %v193_v11 = vsel %vm187_vm2, %v183_v6, %v188_v8  ;;  %s227_s12 = scalar_lea.sflag [#allocation4], %s631_s20  ;;  %s442_s15 = scalar_lea.vmem %s660_s4, 256 }
  0x31   : > { %v197_v14 = vsel %vm194_vm3, %v195_v9, %v196_v10  ;;  %v190_v18 = vsel %vm187_vm2, %v188_v8, %v189_v12  ;;  %v200_v20 = vsel %vm194_vm3, %v196_v10, %v184_v7  ;;  %p443_p8 = scmp.ne.s32.totalorder %s660_s4, %s442_s15  ;;  %s529_s16 = smov [#allocation5]  }
  0x32   : > { %s446_s18 = sshll.u32 %s529_s16, 4  ;;  %s447_s18 = int_to_ptr.vmem [resolvable:$false] %s446_s18 }
  0x33   : > { %217 = vperm.xlu1 %412, %v202_v5   ;;  %207 = vperm.xlu0 %411, %v202_v5   ;;  %p444_p12 = pnand %p443_p8, %p598_p9  ;;  %s448_s19 = scalar_lea.vmem %s447_s18, 512 }
  0x34   : > { %p449_p1 = scmp.lt.s32.totalorder %s660_s4, %s447_s18  ;;  %p450_p3 = scmp.lt.s32.totalorder %s448_s19, %s442_s15 }
  0x35   : > { %p445_p0 = pneg %p444_p12 }
  0x36   : > { %p451_p5 = por %p450_p3, %p449_p1 }
  0x37   : > { %413 = vset.pattern.permute.xlu0 %v527_v0 }
  0x38   : > { %p452_p6 = pnand %p451_p5, %p445_p0 }
  0xaa   : > { %v215_v13 = vpop.permute.xlu1 %214  ;;  %v205_v15 = vpop.permute.xlu0 %204 }
  0xab   : > { %vm219_vm4 = vcmp.eq.s32.totalorder %v215_v13, 1  ;;  %vm209_vm6 = vcmp.eq.s32.totalorder %v205_v15, 1 }
  0xac   : > { %v211_v16 = vsel %vm209_vm6, %v193_v11, %v183_v6 }
  0xad   : > { %v221_v17 = vsel %vm219_vm4, %v197_v14, %v211_v16 }
  0xae   : > { %224 = vst.msk [vmem:[%s178_s21] sm:$0xff] %vm223_vm5, %v221_v17  ;;  %v218_v19 = vpop.permute.xlu1 %217  ;;  %v208_v21 = vpop.permute.xlu0 %207 }
  0xaf   : > { %vm220_vm7 = vcmp.eq.s32.totalorder %v218_v19, 1  ;;  %vm210_vm8 = vcmp.eq.s32.totalorder %v208_v21, 1 }
  0xb0   : > { %v212_v22 = vsel %vm210_vm8, %v190_v18, %v184_v7 }
  0xb1   : > { %v222_v23 = vsel %vm220_vm7, %v200_v20, %v212_v22 }
  0xb2   : > { %225 = vst.msk [vmem:[%s178_s21 + $0x8] sm:$0xff] %vm223_vm5, %v222_v23 }
  0xb3   : > { %455 = shalt.err (!%p452_p6)
}
  0xb4   : > { %s456_s25 = scalar_lea.hbm %s658_s8, 256  ;;  %s460_s28 = scalar_lea.hbm %s711_s2, 512 }
  0xb5   : > { %p457_p7 = scmp.ne.s32.totalorder %s658_s8, %s456_s25  ;;  %p461_p13 = scmp.lt.s32.totalorder %s658_s8, %s711_s2 }
  0xb6   : > { %p462_p2 = scmp.lt.s32.totalorder %s460_s28, %s456_s25 }
  0xb7   : > { %p458_p10 = pnand %p457_p7, %p598_p9 }
  0xb8   : > { %p463_p8 = por %p462_p2, %p461_p13 }
  0xb9   : > { %p459_p4 = pneg %p458_p10 }
  0xbb   : > { %p464_p12 = pnand %p463_p8, %p459_p4 }
  0xbd   : > { %467 = shalt.err (!%p464_p12)
}
  0xbe   : > { %s530_s3 = smov 128   ;;  %s531_s21 = smov 8  }
  0xbf   : > { %345 = dma.vmem_to_hbm [thread:$0]  (%p598_p9), %s660_s4, 256, %s658_s8, %s227_s12, %s530_s3, %s530_s3, %s531_s21  }
  0xc0 PF: > { %s256_s5 = sand.u32 1, %s502_s9   ;;  %p717_p0 = scmp.ge.s32.totalorder %s522_s14, 2 }
  0xc1   : > { %s257_s6 = scalar_lea.sflag [#allocation4], %s256_s5 }
  0xc2   : > { %p352_p1 = pnand %p717_p0, %p605_p11 }
  0xc4   : > { %p353_p3 = pneg %p352_p1 }
  0xc6   : > { %497 = dma.done.wait (%p353_p3), %s257_s6, 256  }
  0xc7   : > { %499 = vsyncadd (%p353_p3), %s257_s6, 4294967040  ;;  %s18_s14 = sadd.s32 1, %s522_s14   ;;  %s718_s9 = smov %s506_s10 }
  0xc8   : > { %p15_p5 = scmp.ge.s32.totalorder %s18_s14, 4   ;;  %s719_s10 = smov %s510_s11 }
  0xc9   : > { %s720_s11 = smov %s603_s23  ;;  %s721_s12 = smov %s518_s13 }
  0xca   : > { %s722_s13 = smov %s724_s17  ;;  %17 = sbr.rel (!%p15_p5) target bundleno = 6 (0x6), region = 73 }
  0xcf   :  { %262 = vsyncpa [#allocation3], 1 }
  0xd0   :  { %264 = vsyncpa [#allocation3 + $0x1], 1 }
  0xd1   :  { %265 = vsyncpa [#allocation4], 1 }
  0xd2   :  { %267 = vsyncpa [#allocation4 + $0x1], 1 }

</bundles_post_ra>
